<compile_context>
chip_gen: v5e
topology: v5e:2x2
jax: 0.10.0
libtpu: 0.0.40
codegen_flags: <defaults>
</compile_context>

<pallas_src>
import jax
import jax.numpy as jnp
from jax.experimental import pallas as pl
from jax.experimental.pallas import tpu as pltpu

_LANES = 1024  # preferred lane-dense last dim (8 * 128) -> unmasked vst


def _identity_copy_kernel(x_ref, o_ref):
    # Bare copy only — no extra elementwise work (v5e has a single vst slot).
    o_ref[...] = x_ref[...]


def identity(x: jax.Array) -> jax.Array:
    """Identity.forward: `return x`.  Kernel is elided — zero HBM traffic."""
    return x


def _choose_lanes(n: int):
    """Largest lane-dense width that divides n exactly (no pad needed)."""
    for lanes in (1024, 512, 256, 128):
        if n % lanes == 0:
            return lanes
    return None


def _sublane_multiple(dtype) -> int:
    # f32 -> 8, bf16/f16 -> 16, int8/fp8 -> 32 (packed sublanes).
    return max(8, 32 // jnp.dtype(dtype).itemsize)


def _vmem_budget():
    """Per-chip (target_block_bytes, vmem_limit_bytes)."""
    try:
        vmem_cap = pltpu.get_tpu_info().vmem_capacity_bytes
    except Exception:
        vmem_cap = 64 * 1024 * 1024  # conservative (v7x-sized) fallback
    if vmem_cap >= 128 * 1024 * 1024:
        # v5e / v6e: 8 MiB blocks -> ~32 MiB live with double-buffered in+out.
        return 8 * 1024 * 1024, 64 * 1024 * 1024
    # v7x: 64 MiB physical -> cap blocks at 4 MiB (~16 MiB live).
    return 4 * 1024 * 1024, 24 * 1024 * 1024


def identity_pallas(x: jax.Array, *, donate: bool = False) -> jax.Array:
    """Forced Pallas copy of x (only when a materialized copy is required).

    donate=True aliases the output onto the input buffer (caller must donate x);
    default False returns a genuinely distinct buffer.
    """
    if x.size == 0:
        return x

    orig_shape = x.shape
    dtype = x.dtype
    itemsize = jnp.dtype(dtype).itemsize
    n = x.size

    # ---- Lay the data out as (rows, lanes) with a lane-dense last dim. ----
    lanes = _choose_lanes(n)
    padded = None
    if lanes is None:
        # Genuinely ragged size: pad once to a 1024 multiple (only this path
        # pays extra HBM traffic for the pad + trailing slice).
        lanes = _LANES
        padded = pl.cdiv(n, lanes) * lanes
        flat = jnp.pad(x.reshape(-1), (0, padded - n))
        x2d = flat.reshape(padded // lanes, lanes)
    else:
        # Free reshape of the contiguous input — no pad, no extra traffic.
        x2d = x.reshape(n // lanes, lanes)

    rows = x2d.shape[0]
    sub = _sublane_multiple(dtype)
    target_block_bytes, vmem_limit = _vmem_budget()

    # Dtype-aware, per-chip row tiling: biggest block within the byte budget,
    # rounded down to the sublane multiple.
    tile_rows = max(sub, (target_block_bytes // (lanes * itemsize)) // sub * sub)

    if rows <= tile_rows:
        if rows >= 2 * sub and rows * lanes * itemsize > (1 << 20):
            # Medium tensor fitting one block: split into >=2 blocks so the
            # pipeline overlaps in/out DMA and both v7x TCs can participate.
            tile_rows = max(sub, (rows // 2) // sub * sub)
        else:
            # Small tensor: full-extent block (always a legal block shape).
            tile_rows = rows

    grid = (pl.cdiv(rows, tile_rows),)

    out2d = pl.pallas_call(
        _identity_copy_kernel,
        out_shape=jax.ShapeDtypeStruct((rows, lanes), dtype),
        grid=grid,
        in_specs=[pl.BlockSpec((tile_rows, lanes), lambda i: (i, 0))],
        out_specs=pl.BlockSpec((tile_rows, lanes), lambda i: (i, 0)),
        # Aliasing is opt-in: only when the caller explicitly donates x.
        input_output_aliases=({0: 0} if donate else {}),
        # Pure memory traffic hint for XLA's scheduler.
        cost_estimate=pl.CostEstimate(
            flops=0, transcendentals=0,
            bytes_accessed=2 * rows * lanes * itemsize),
        compiler_params=pltpu.CompilerParams(
            # 'parallel' lets the row grid shard across v7x's 2 TCs;
            # on v5e/v6e (1 TC) it is equivalent to 'arbitrary'.
            dimension_semantics=("parallel",),
            vmem_limit_bytes=vmem_limit,
        ),
    )(x2d)

    if padded is not None:
        return out2d.reshape(-1)[:n].reshape(orig_shape)
    return out2d.reshape(orig_shape)


if __name__ == "__main__":
    key = jax.random.PRNGKey(0)
    k0, k1 = jax.random.split(key)

    # NCHW input, small shapes: batch=2, channels=4, spatial=16x16 (f32).
    x = jax.random.normal(k0, (2, 4, 16, 16), dtype=jnp.float32)

    # Primary (optimized) path: Identity is elided entirely.
    y_fast = identity(x)
    assert y_fast is x

    # Forced-copy Pallas path — lane-dense no-pad branch (2048 % 1024 == 0).
    y = identity_pallas(x)
    jax.block_until_ready(y)
    assert y.shape == x.shape, (y.shape, x.shape)
    assert y.dtype == x.dtype, (y.dtype, x.dtype)
    assert bool(jnp.all(y == x)), "Identity kernel output differs from input"

    # Ragged-size branch (105 elements -> pad/slice fallback).
    z = jax.random.normal(k1, (3, 5, 7), dtype=jnp.float32)
    zy = identity_pallas(z)
    jax.block_until_ready(zy)
    assert zy.shape == z.shape and zy.dtype == z.dtype
    assert bool(jnp.all(zy == z)), "Ragged identity kernel output differs"

    print("KERNEL_OK")
</pallas_src>

<mosaic_0001>
module attributes {stable_mosaic.version = 11 : i64} {
  func.func @_identity_copy_kernel(%arg0: i32, %arg1: memref<2x1024xf32, #tpu.memory_space<vmem>>, %arg2: memref<2x1024xf32, #tpu.memory_space<vmem>>) attributes {dimension_semantics = [#tpu.dimension_semantics<parallel>], iteration_bounds = array<i64: 1>, scalar_prefetch = 0 : i64, scratch_operands = 0 : i64, tpu.core_type = #tpu.core_type<tc>, window_params = [{transform_indices = @transform_0, window_bounds = array<i64: 2, 1024>}, {transform_indices = @transform_1, window_bounds = array<i64: 2, 1024>}]} {
    %c0 = arith.constant 0 : index
    %c0_0 = arith.constant 0 : index
    %0 = vector.load %arg1[%c0, %c0_0] : memref<2x1024xf32, #tpu.memory_space<vmem>>, vector<2x1024xf32>
    %c0_1 = arith.constant 0 : index
    %c0_2 = arith.constant 0 : index
    %1 = vector.load %arg2[%c0_1, %c0_2] : memref<2x1024xf32, #tpu.memory_space<vmem>>, vector<2x1024xf32>
    tpu.vector_store %arg2[%c0_1, %c0_2], %0 {strides = array<i32>} : memref<2x1024xf32, #tpu.memory_space<vmem>>, vector<2x1024xf32>,
    return
  }
  func.func @transform_0(%arg0: i32) -> (i32, i32) {
    %c0_i32 = arith.constant 0 : i32
    %c0_i32_0 = arith.constant 0 : i32
    return %arg0, %c0_i32 : i32, i32
  }
  func.func @transform_1(%arg0: i32) -> (i32, i32) {
    %c0_i32 = arith.constant 0 : i32
    %c0_i32_0 = arith.constant 0 : i32
    return %arg0, %c0_i32 : i32, i32
  }
}

</mosaic_0001>

<bundles_post_ra>
// kernel: tpu_custom_call.1
= control target key start
LH: loop header
LB: loop body
LE: loop exit
PB: predicated region body
PF: predicated region fallthrough
CT: control target
= control target key end

     0   :  { %6 = vsyncpa [#allocation3], 0  ;;  %s116_s0 = inlined_call_operand.hbm [shape: f32[2,1024], index: 0, kind: input, shape index: {}]   ;;  %s117_s1 = inlined_call_operand.hbm [shape: f32[2,1024], index: 1, kind: output, shape index: {}]  }
   0x1   :  { %7 = vsyncpa [#allocation4], 0  ;;  %s13_s8 = sshll.u32 %s116_s0, 4  ;;  %s98_s9 = smov [#allocation2]   ;;  %s14_s8 = int_to_ptr.hbm [resolvable:$true] %s13_s8 }
   0x2   :  { %s15_s10 = sshll.u32 %s98_s9, 4  ;;  %s16_s10 = int_to_ptr.vmem [resolvable:$true] %s15_s10 }
   0x3   :  { %18 = dma.hbm_to_vmem [thread:$0]  %s14_s8, 256, %s16_s10, [#allocation3]  }
   0x4   :  { %94 = dma.done.wait [#allocation3], 256  }
   0x5   :  { %95 = vsyncadd [#allocation3], 4294967040  ;;  %s99_s11 = smov [#allocation5]   ;;  %s34_s15 = sshll.u32 %s117_s1, 4  ;;  %v23_v0 = vld [vmem:[#allocation2] sm:$0xff]  ;;  %v24_v1 = vld [vmem:[#allocation2 + $0x8] sm:$0xff]  ;;  %s35_s15 = int_to_ptr.hbm [resolvable:$true] %s34_s15 }
   0x6   :  { %s32_s12 = sshll.u32 %s99_s11, 4  ;;  %25 = vst [vmem:[#allocation5] sm:$0xff] %v23_v0  ;;  %s33_s12 = int_to_ptr.vmem [resolvable:$true] %s32_s12 }
   0x7   :  { %26 = vst [vmem:[#allocation5 + $0x8] sm:$0xff] %v24_v1 }
   0x8   :  { %37 = dma.vmem_to_hbm [thread:$0]  %s33_s12, 256, %s35_s15, [#allocation4]  }
   0x9   :  { %96 = dma.done.wait [#allocation4], 256  }
   0xa   :  { %97 = vsyncadd [#allocation4], 4294967040 }
   0xb   :  { %42 = vsyncpa [#allocation3], 1 }
   0xc   :  { %43 = vsyncpa [#allocation4], 1 }

</bundles_post_ra>
